<compile_context>
chip_gen: v7x
topology: tpu7x:2x2x1
jax: 0.10.0
libtpu: 0.0.40
codegen_flags: <defaults>
</compile_context>

<pallas_src>
import functools

import jax
import jax.numpy as jnp
from jax.experimental import pallas as pl
from jax.experimental.pallas import tpu as pltpu


# ----------------------------- chip / tiling helpers --------------------------

_ROW_TILE_CANDIDATES = (2048, 1024, 512, 256, 128, 64, 32, 16, 8)


def _vmem_budget():
    """Per-chip VMEM budget (bytes) for block sizing and vmem_limit_bytes."""
    try:
        cap = int(pltpu.get_tpu_info().vmem_capacity_bytes)  # 128 MiB v5e/v6e, 64 MiB v7x
    except Exception:  # pragma: no cover - defensive fallback
        cap = 64 * 1024 * 1024
    return min(int(cap * 0.75), 100 * 1024 * 1024)


def _num_tensorcores():
    """TensorCores sharing the grid (v7x: 2).  Defensive: default to 1 (v5e/v6e)."""
    try:
        info = pltpu.get_tpu_info()
        for attr in ("num_cores", "core_count", "num_tensorcores", "tensorcore_count"):
            if hasattr(info, attr):
                n = int(getattr(info, attr))
                if n >= 1:
                    return n
    except Exception:  # pragma: no cover
        pass
    return 1


def _pick_divisor_tile(dim, candidates):
    for c in candidates:
        if dim % c == 0:
            return c
    return dim  # full extent


def _min_row_tile(dtype):
    # Sub-32-bit dtypes pack along sublanes; keep row tiles >= the packed min tile.
    return max(8, 32 // max(1, jnp.dtype(dtype).itemsize))


def _pick_row_tile(rows, bytes_per_row, fixed_bytes, budget, *, dtype=jnp.float32):
    """Largest row tile fitting the VMEM budget.  Single-TC chips: take the largest
    (minimizes weight re-streaming / per-step overhead).  Multi-TC chips: prefer a
    core-balanced row-grid extent without shrinking the tile by more than 2x."""
    min_tile = _min_row_tile(dtype)
    cands = [t for t in _ROW_TILE_CANDIDATES if min_tile <= t <= rows]
    if not cands:
        return rows  # tiny input: single full-extent block
    fitting = [t for t in cands if fixed_bytes + t * bytes_per_row <= budget] or [cands[-1]]
    ncores = _num_tensorcores()
    if ncores >= 2:
        balanced = [t for t in fitting
                    if pl.cdiv(rows, t) % ncores == 0 and t >= fitting[0] // 2]
        if balanced:
            return balanced[0]
    return fitting[0]


# ----------------------------- kernels ---------------------------------------


def _ln_normalize_to_scratch(x_ref, a2_ref, b2_ref, normed_ref, eps, feat):
    """Torch-style LayerNorm (unbiased std, eps added to std) with a two-pass centered
    variance; writes normalized rows to `normed_ref` in the MXU dtype.  Runs ONCE per
    row block."""
    x = x_ref[...].astype(jnp.float32)                               # (tm, F)
    mean = jnp.sum(x, axis=-1, keepdims=True) * (1.0 / feat)
    centered = x - mean
    var = jnp.sum(centered * centered, axis=-1, keepdims=True) * (1.0 / (feat - 1.0))
    std = jnp.sqrt(var)
    inv = pl.reciprocal(std + eps, approx=False)                     # eps on std
    normed = (a2_ref[...].astype(jnp.float32) * centered * inv
              + b2_ref[...].astype(jnp.float32))
    normed_ref[...] = normed.astype(normed_ref.dtype)


def _fused_fullk_kernel(x_ref, w_ref, bias_ref, a2_ref, b2_ref, o_ref,
                        normed_ref, *, eps, feat):
    """LN (hoisted) -> full-K matmul -> + bias + residual.  grid = (rows, N_tiles)."""
    j = pl.program_id(1)

    @pl.when(j == 0)
    def _():
        _ln_normalize_to_scratch(x_ref, a2_ref, b2_ref, normed_ref, eps, feat)

    out = jnp.dot(normed_ref[...], w_ref[...], preferred_element_type=jnp.float32)
    tn = o_ref.shape[-1]
    joff = pl.multiple_of(j * tn, tn)
    x_res = x_ref[:, pl.ds(joff, tn)].astype(jnp.float32)            # residual slice of x
    # dropout is identity in eval mode
    o_ref[...] = (out + bias_ref[...].astype(jnp.float32) + x_res).astype(o_ref.dtype)


def _fused_ktiled_kernel(x_ref, w_ref, bias_ref, a2_ref, b2_ref, o_ref,
                         normed_ref, acc_ref, *, eps, feat, tk):
    """Large-F fallback: k-tiled matmul with f32 accumulator.  grid = (rows, N, K)."""
    j = pl.program_id(1)
    k = pl.program_id(2)

    @pl.when((j == 0) & (k == 0))
    def _():
        _ln_normalize_to_scratch(x_ref, a2_ref, b2_ref, normed_ref, eps, feat)

    @pl.when(k == 0)
    def _():
        acc_ref[...] = jnp.zeros_like(acc_ref)

    koff = pl.multiple_of(k * tk, tk)
    acc_ref[...] += jnp.dot(normed_ref[:, pl.ds(koff, tk)], w_ref[...],
                            preferred_element_type=jnp.float32)

    @pl.when(k == pl.num_programs(2) - 1)
    def _():
        tn = o_ref.shape[-1]
        joff = pl.multiple_of(j * tn, tn)
        x_res = x_ref[:, pl.ds(joff, tn)].astype(jnp.float32)
        o_ref[...] = (acc_ref[...] + bias_ref[...].astype(jnp.float32)
                      + x_res).astype(o_ref.dtype)


def _fused_smallf_kernel(x_ref, w_ref, bias_ref, a2_ref, b2_ref, o_ref, *, eps, feat):
    """Small / lane-irregular hidden sizes: everything fused in one block per row tile."""
    x = x_ref[...].astype(jnp.float32)
    mean = jnp.sum(x, axis=-1, keepdims=True) * (1.0 / feat)
    centered = x - mean
    var = jnp.sum(centered * centered, axis=-1, keepdims=True) * (1.0 / (feat - 1.0))
    std = jnp.sqrt(var)
    inv = pl.reciprocal(std + eps, approx=False)
    normed = (a2_ref[...].astype(jnp.float32) * centered * inv
              + b2_ref[...].astype(jnp.float32))
    out = jnp.dot(normed.astype(w_ref.dtype), w_ref[...],
                  preferred_element_type=jnp.float32)
    o_ref[...] = (out + bias_ref[...].astype(jnp.float32) + x).astype(o_ref.dtype)


def _layernorm_kernel(x_ref, a_ref, b_ref, o_ref, *, eps, feat):
    """Row-wise torch-style LayerNorm (generic path)."""
    x = x_ref[...].astype(jnp.float32)
    mean = jnp.sum(x, axis=-1, keepdims=True) * (1.0 / feat)
    centered = x - mean
    var = jnp.sum(centered * centered, axis=-1, keepdims=True) * (1.0 / (feat - 1.0))
    std = jnp.sqrt(var)
    inv = pl.reciprocal(std + eps, approx=False)
    o_ref[...] = (a_ref[...].astype(jnp.float32) * centered * inv
                  + b_ref[...].astype(jnp.float32)).astype(o_ref.dtype)


def _residual_add_kernel(x_ref, s_ref, o_ref):
    """out = x + dropout(sublayer_out); dropout is identity in eval mode."""
    o_ref[...] = x_ref[...] + s_ref[...]


# ----------------------------- wrappers ---------------------------------------


def sublayer_connection_linear(x, w, b, a_2, b_2, eps=1e-6, *,
                               matmul_dtype=None, force_k_tiling=False,
                               tile_n=None, tile_k=None):
    """Fully fused SublayerConnection for a linear sublayer:
       out = x + (LayerNorm(x) @ w + b), single Pallas kernel.

    matmul_dtype: dtype fed to the MXU (weights are cast once, outside the kernel).
      Default: x.dtype (so bf16 models get a bf16 MXU automatically); pass
      jnp.bfloat16 to force bf16 MXU for f32 inputs (~3x MXU throughput)."""
    B, S, F = x.shape
    assert w.shape == (F, F), "residual connection requires same-size linear sublayer"
    assert b.shape == (F,)
    rows = B * S

    if matmul_dtype is None:
        matmul_dtype = x.dtype
    matmul_dtype = jnp.dtype(matmul_dtype)

    xf = x.reshape(rows, F)
    a2 = a_2.reshape(1, F)
    b2 = b_2.reshape(1, F)
    bb = b.reshape(1, F)
    wk = w.astype(matmul_dtype)            # cast ONCE outside the kernel (halved HBM stream)

    itemsize = x.dtype.itemsize
    mm_itemsize = matmul_dtype.itemsize
    budget = _vmem_budget()

    # ---- Small / lane-irregular hidden size: single fused block per row tile --------
    if F < 128 or F % 128 != 0:
        bytes_per_row = (2 * F * itemsize      # x (double-buffered)
                         + 2 * F * itemsize    # out (double-buffered)
                         + 4 * F * 4)          # f32 temporaries (x, centered, normed, dot)
        fixed = 2 * F * F * mm_itemsize + 6 * F * itemsize
        tm = _pick_row_tile(rows, bytes_per_row, fixed, budget, dtype=x.dtype)
        out = pl.pallas_call(
            functools.partial(_fused_smallf_kernel, eps=float(eps), feat=float(F)),
            out_shape=jax.ShapeDtypeStruct((rows, F), x.dtype),
            grid_spec=pltpu.PrefetchScalarGridSpec(
                num_scalar_prefetch=0,
                grid=(pl.cdiv(rows, tm),),
                in_specs=[
                    pl.BlockSpec((tm, F), lambda i: (i, 0)),
                    pl.BlockSpec((F, F), lambda i: (0, 0)),
                    pl.BlockSpec((1, F), lambda i: (0, 0)),
                    pl.BlockSpec((1, F), lambda i: (0, 0)),
                    pl.BlockSpec((1, F), lambda i: (0, 0)),
                ],
                out_specs=pl.BlockSpec((tm, F), lambda i: (i, 0)),
            ),
            compiler_params=pltpu.CompilerParams(
                dimension_semantics=("parallel",),
                vmem_limit_bytes=budget,
            ),
        )(xf, wk, bb, a2, b2)
        return out.reshape(B, S, F)

    # ---- MXU path --------------------------------------------------------------
    tn = tile_n if tile_n is not None else _pick_divisor_tile(F, (512, 256, 128))
    assert F % tn == 0

    # Full-K variant: drop the k grid axis + f32 accumulator when the (F, tn) weight
    # slab fits comfortably in the VMEM budget (true for F up to several K).
    w_slab_bytes = 2 * F * tn * mm_itemsize         # double-buffered weight block
    full_k = (not force_k_tiling) and (w_slab_bytes <= budget // 3)

    if full_k:
        bytes_per_row = (2 * F * itemsize           # resident x rows (double-buffered)
                         + 2 * tn * itemsize        # output block
                         + F * mm_itemsize          # normed scratch (once per row block)
                         + 3 * F * 4)               # f32 temporaries in the stats pass
        fixed = w_slab_bytes + 2 * (tn + 2 * F) * itemsize
        # TODO(synk): on v7x (64 MiB VMEM), x only changes on the slow row axis;
        #   pipeline_mode=pl.Buffered(1) on the x spec would recover a full (tm, F) buffer.
        tm = _pick_row_tile(rows, bytes_per_row, fixed, budget, dtype=x.dtype)
        grid = (pl.cdiv(rows, tm), F // tn)
        out = pl.pallas_call(
            functools.partial(_fused_fullk_kernel, eps=float(eps), feat=float(F)),
            out_shape=jax.ShapeDtypeStruct((rows, F), x.dtype),
            grid_spec=pltpu.PrefetchScalarGridSpec(
                num_scalar_prefetch=0,
                grid=grid,
                in_specs=[
                    pl.BlockSpec((tm, F), lambda i, j: (i, 0)),   # x rows: 1 HBM pass / block
                    pl.BlockSpec((F, tn), lambda i, j: (0, j)),   # full-K weight slab
                    pl.BlockSpec((1, tn), lambda i, j: (0, j)),   # bias
                    pl.BlockSpec((1, F), lambda i, j: (0, 0)),    # LN scale
                    pl.BlockSpec((1, F), lambda i, j: (0, 0)),    # LN shift
                ],
                out_specs=pl.BlockSpec((tm, tn), lambda i, j: (i, j)),
                scratch_shapes=[
                    pltpu.VMEM((tm, F), matmul_dtype),            # normalized rows
                ],
            ),
            compiler_params=pltpu.CompilerParams(
                # j carries the hoisted normed scratch -> must stay "arbitrary".
                dimension_semantics=("parallel", "arbitrary"),
                vmem_limit_bytes=budget,
            ),
        )(xf, wk, bb, a2, b2)
        return out.reshape(B, S, F)

    # ---- Large-F fallback: k-tiled matmul with f32 accumulator -------------------
    tk = tile_k if tile_k is not None else _pick_divisor_tile(F, (512, 256, 128))
    assert F % tk == 0
    bytes_per_row = (2 * F * itemsize + 2 * tn * itemsize
                     + F * mm_itemsize + tn * 4 + 3 * F * 4)
    fixed = 2 * tk * tn * mm_itemsize + 2 * (tn + 2 * F) * itemsize
    tm = _pick_row_tile(rows, bytes_per_row, fixed, budget, dtype=x.dtype)
    grid = (pl.cdiv(rows, tm), F // tn, F // tk)    # reduction axis last

    out = pl.pallas_call(
        functools.partial(_fused_ktiled_kernel, eps=float(eps), feat=float(F), tk=tk),
        out_shape=jax.ShapeDtypeStruct((rows, F), x.dtype),
        grid_spec=pltpu.PrefetchScalarGridSpec(
            num_scalar_prefetch=0,
            grid=grid,
            in_specs=[
                pl.BlockSpec((tm, F), lambda i, j, k: (i, 0)),    # x rows, resident
                pl.BlockSpec((tk, tn), lambda i, j, k: (k, j)),   # weights
                pl.BlockSpec((1, tn), lambda i, j, k: (0, j)),    # bias
                pl.BlockSpec((1, F), lambda i, j, k: (0, 0)),     # LN scale
                pl.BlockSpec((1, F), lambda i, j, k: (0, 0)),     # LN shift
            ],
            out_specs=pl.BlockSpec((tm, tn), lambda i, j, k: (i, j)),
            scratch_shapes=[
                pltpu.VMEM((tm, F), matmul_dtype),    # normalized rows (once per row block)
                pltpu.VMEM((tm, tn), jnp.float32),    # matmul accumulator
            ],
        ),
        compiler_params=pltpu.CompilerParams(
            dimension_semantics=("parallel", "arbitrary", "arbitrary"),
            vmem_limit_bytes=budget,
        ),
    )(xf, wk, bb, a2, b2)
    return out.reshape(B, S, F)


def pallas_layernorm(x, a_2, b_2, eps=1e-6):
    """x: (B, S, F); a_2, b_2: (F,).  Torch-style LayerNorm of the module (generic path)."""
    B, S, F = x.shape
    rows = B * S
    xf = x.reshape(rows, F)
    a2 = a_2.reshape(1, F)
    b2 = b_2.reshape(1, F)

    itemsize = x.dtype.itemsize
    budget = _vmem_budget()
    bytes_per_row = 4 * F * itemsize + 3 * F * 4     # x/out double-buffered + f32 temporaries
    tr = _pick_row_tile(rows, bytes_per_row, 4 * F * itemsize, budget, dtype=x.dtype)

    out = pl.pallas_call(
        functools.partial(_layernorm_kernel, eps=float(eps), feat=float(F)),
        out_shape=jax.ShapeDtypeStruct((rows, F), x.dtype),
        grid_spec=pltpu.PrefetchScalarGridSpec(
            num_scalar_prefetch=0,
            grid=(pl.cdiv(rows, tr),),
            in_specs=[
                pl.BlockSpec((tr, F), lambda i: (i, 0)),
                pl.BlockSpec((1, F), lambda i: (0, 0)),
                pl.BlockSpec((1, F), lambda i: (0, 0)),
            ],
            out_specs=pl.BlockSpec((tr, F), lambda i: (i, 0)),
        ),
        compiler_params=pltpu.CompilerParams(
            dimension_semantics=("parallel",),
            vmem_limit_bytes=budget,
        ),
    )(xf, a2, b2)
    return out.reshape(B, S, F)


def pallas_residual_add(x, s):
    """out = x + s, elementwise, presented lane-dense when possible."""
    assert x.shape == s.shape and x.dtype == s.dtype
    orig_shape = x.shape
    total = x.size

    lane = None
    for c in (4096, 2048, 1024, 512, 256, 128):      # lane-dense output (multiple of 128)
        if total % c == 0:
            lane = c
            break
    if lane is None:
        lane = orig_shape[-1]
    rows = total // lane

    xf = x.reshape(rows, lane)
    sf = s.reshape(rows, lane)

    itemsize = x.dtype.itemsize
    budget = _vmem_budget()
    tr = _pick_row_tile(rows, 6 * lane * itemsize, 0, budget, dtype=x.dtype)

    out = pl.pallas_call(
        _residual_add_kernel,
        out_shape=jax.ShapeDtypeStruct((rows, lane), x.dtype),
        grid_spec=pltpu.PrefetchScalarGridSpec(
            num_scalar_prefetch=0,
            grid=(pl.cdiv(rows, tr),),
            in_specs=[
                pl.BlockSpec((tr, lane), lambda i: (i, 0)),
                pl.BlockSpec((tr, lane), lambda i: (i, 0)),
            ],
            out_specs=pl.BlockSpec((tr, lane), lambda i: (i, 0)),
        ),
        compiler_params=pltpu.CompilerParams(
            dimension_semantics=("parallel",),
            vmem_limit_bytes=budget,
        ),
        input_output_aliases={1: 0},   # reuse the sublayer-output buffer for the result (P8)
    )(xf, sf)
    return out.reshape(orig_shape)


def sublayer_connection(x, sublayer, a_2, b_2, eps=1e-6):
    """Generic (arbitrary sublayer callable) path: Pallas LN -> sublayer -> Pallas residual."""
    normed = pallas_layernorm(x, a_2, b_2, eps=eps)
    s = sublayer(normed)          # arbitrary sublayer (plain-JAX glue)
    return pallas_residual_add(x, s)


# ----------------------------- reference + demo --------------------------------


def _reference(x, sublayer, a_2, b_2, eps=1e-6):
    """Pure-JAX reference mirroring the PyTorch forward (eval mode)."""
    mean = jnp.mean(x, axis=-1, keepdims=True)
    n = x.shape[-1]
    var = jnp.sum((x - mean) ** 2, axis=-1, keepdims=True) / (n - 1)
    std = jnp.sqrt(var)
    normed = a_2 * (x - mean) / (std + eps) + b_2
    return x + sublayer(normed)


def _make_case(key, batch, seq, hidden):
    kx, kw, kb = jax.random.split(key, 3)
    x = jax.random.normal(kx, (batch, seq, hidden), dtype=jnp.float32)
    a_2 = jnp.ones((hidden,), dtype=jnp.float32)
    b_2 = jnp.zeros((hidden,), dtype=jnp.float32)
    w = jax.random.normal(kw, (hidden, hidden), dtype=jnp.float32) * 0.02
    b = jax.random.normal(kb, (hidden,), dtype=jnp.float32) * 0.01
    return x, w, b, a_2, b_2


if __name__ == "__main__":
    key = jax.random.PRNGKey(0)
    k1, k2, k3 = jax.random.split(key, 3)
    batch, seq = 2, 8

    # --- Case 1: main fused full-K MXU path (hidden = 128, f32 MXU) -----------------
    x, w, b, a_2, b_2 = _make_case(k1, batch, seq, 128)
    sub = lambda h: jnp.dot(h, w) + b
    ref = _reference(x, sub, a_2, b_2, eps=1e-6)

    out_fused = jax.block_until_ready(
        sublayer_connection_linear(x, w, b, a_2, b_2, eps=1e-6))
    assert out_fused.shape == (batch, seq, 128)
    assert jnp.allclose(out_fused, ref, atol=1e-4, rtol=1e-4), "fused full-K mismatch"

    # --- Case 2: same inputs, bf16 MXU (weights/normed cast once; ~3x MXU throughput)
    out_bf16 = jax.block_until_ready(
        sublayer_connection_linear(x, w, b, a_2, b_2, eps=1e-6,
                                   matmul_dtype=jnp.bfloat16))
    assert jnp.allclose(out_bf16, ref, atol=3e-2, rtol=3e-2), "bf16-MXU path mismatch"

    # --- Case 3: generic path (arbitrary sublayer callable) -------------------------
    out_generic = jax.block_until_ready(sublayer_connection(x, sub, a_2, b_2, eps=1e-6))
    assert jnp.allclose(out_generic, ref, atol=1e-4, rtol=1e-4), "generic path mismatch"

    # --- Case 4: large-F fallback (k-tiled accumulator), forced at hidden = 256 -----
    x4, w4, b4, a_24, b_24 = _make_case(k2, batch, seq, 256)
    sub4 = lambda h: jnp.dot(h, w4) + b4
    ref4 = _reference(x4, sub4, a_24, b_24, eps=1e-6)
    out_kt = jax.block_until_ready(
        sublayer_connection_linear(x4, w4, b4, a_24, b_24, eps=1e-6,
                                   force_k_tiling=True, tile_n=128, tile_k=128))
    assert jnp.allclose(out_kt, ref4, atol=1e-4, rtol=1e-4), "k-tiled path mismatch"

    # --- Case 5: small hidden size (32 < 128) takes the fused single-block path -----
    x5, w5, b5, a_25, b_25 = _make_case(k3, batch, seq, 32)
    sub5 = lambda h: jnp.dot(h, w5) + b5
    ref5 = _reference(x5, sub5, a_25, b_25, eps=1e-6)
    out_small = jax.block_until_ready(
        sublayer_connection_linear(x5, w5, b5, a_25, b_25, eps=1e-6))
    assert jnp.allclose(out_small, ref5, atol=1e-4, rtol=1e-4), "small-F path mismatch"

    print("KERNEL_OK")
</pallas_src>

<mosaic_0001>
module attributes {stable_mosaic.version = 11 : i64} {
  func.func @_fused_fullk_kernel(%arg0: i32, %arg1: i32, %arg2: memref<16x128xf32, #tpu.memory_space<vmem>>, %arg3: memref<128x128xf32, #tpu.memory_space<vmem>>, %arg4: memref<1x128xf32, #tpu.memory_space<vmem>>, %arg5: memref<1x128xf32, #tpu.memory_space<vmem>>, %arg6: memref<1x128xf32, #tpu.memory_space<vmem>>, %arg7: memref<16x128xf32, #tpu.memory_space<vmem>>, %arg8: memref<16x128xf32, #tpu.memory_space<vmem>>) attributes {dimension_semantics = [#tpu.dimension_semantics<parallel>, #tpu.dimension_semantics<arbitrary>], iteration_bounds = array<i64: 1, 1>, scalar_prefetch = 0 : i64, scratch_operands = 1 : i64, tpu.core_type = #tpu.core_type<tc>, window_params = [{transform_indices = @transform_0, window_bounds = array<i64: 16, 128>}, {transform_indices = @transform_1, window_bounds = array<i64: 128, 128>}, {transform_indices = @transform_2, window_bounds = array<i64: 1, 128>}, {pipeline_mode = #tpu.pipeline_mode<synchronous>, transform_indices = @transform_3, window_bounds = array<i64: 1, 128>}, {pipeline_mode = #tpu.pipeline_mode<synchronous>, transform_indices = @transform_4, window_bounds = array<i64: 1, 128>}, {transform_indices = @transform_5, window_bounds = array<i64: 16, 128>}]} {
    %c0_i32 = arith.constant 0 : i32
    %0 = arith.cmpi eq, %arg1, %c0_i32 : i32
    %1 = arith.extui %0 : i1 to i32
    %c0_i32_0 = arith.constant 0 : i32
    %2 = arith.cmpi ne, %1, %c0_i32_0 : i32
    scf.if %2 {
      %c0_9 = arith.constant 0 : index
      %c0_10 = arith.constant 0 : index
      %15 = vector.load %arg2[%c0_9, %c0_10] : memref<16x128xf32, #tpu.memory_space<vmem>>, vector<16x128xf32>
      %cst_11 = arith.constant dense<0.000000e+00> : vector<16xf32>
      %16 = vector.multi_reduction <add>, %15, %cst_11 [1] : vector<16x128xf32> to vector<16xf32>
      %17 = vector.shape_cast %16 : vector<16xf32> to vector<16x1xf32>
      %cst_12 = arith.constant 7.812500e-03 : f32
      %18 = vector.broadcast %cst_12 : f32 to vector<16x1xf32>
      %19 = arith.mulf %17, %18 : vector<16x1xf32>
      %20 = vector.broadcast %19 : vector<16x1xf32> to vector<16x128xf32>
      %21 = arith.subf %15, %20 : vector<16x128xf32>
      %22 = arith.mulf %21, %21 : vector<16x128xf32>
      %cst_13 = arith.constant dense<0.000000e+00> : vector<16xf32>
      %23 = vector.multi_reduction <add>, %22, %cst_13 [1] : vector<16x128xf32> to vector<16xf32>
      %24 = vector.shape_cast %23 : vector<16xf32> to vector<16x1xf32>
      %cst_14 = arith.constant 0.00787401571 : f32
      %25 = vector.broadcast %cst_14 : f32 to vector<16x1xf32>
      %26 = arith.mulf %24, %25 : vector<16x1xf32>
      %27 = math.sqrt %26 : vector<16x1xf32>
      %cst_15 = arith.constant 9.99999997E-7 : f32
      %28 = vector.broadcast %cst_15 : f32 to vector<16x1xf32>
      %29 = arith.addf %27, %28 : vector<16x1xf32>
      %30 = tpu.reciprocal %29 : vector<16x1xf32> -> vector<16x1xf32>
      %c0_16 = arith.constant 0 : index
      %c0_17 = arith.constant 0 : index
      %31 = vector.load %arg5[%c0_16, %c0_17] : memref<1x128xf32, #tpu.memory_space<vmem>>, vector<1x128xf32>
      %32 = vector.broadcast %31 : vector<1x128xf32> to vector<16x128xf32>
      %33 = arith.mulf %32, %21 : vector<16x128xf32>
      %34 = vector.broadcast %30 : vector<16x1xf32> to vector<16x128xf32>
      %35 = arith.mulf %33, %34 : vector<16x128xf32>
      %c0_18 = arith.constant 0 : index
      %c0_19 = arith.constant 0 : index
      %36 = vector.load %arg6[%c0_18, %c0_19] : memref<1x128xf32, #tpu.memory_space<vmem>>, vector<1x128xf32>
      %37 = vector.broadcast %36 : vector<1x128xf32> to vector<16x128xf32>
      %38 = arith.addf %35, %37 : vector<16x128xf32>
      %c0_20 = arith.constant 0 : index
      %c0_21 = arith.constant 0 : index
      %39 = vector.load %arg8[%c0_20, %c0_21] : memref<16x128xf32, #tpu.memory_space<vmem>>, vector<16x128xf32>
      tpu.vector_store %arg8[%c0_20, %c0_21], %38 {strides = array<i32>} : memref<16x128xf32, #tpu.memory_space<vmem>>, vector<16x128xf32>,
    } else {
    }
    %c0 = arith.constant 0 : index
    %c0_1 = arith.constant 0 : index
    %3 = vector.load %arg8[%c0, %c0_1] : memref<16x128xf32, #tpu.memory_space<vmem>>, vector<16x128xf32>
    %c0_2 = arith.constant 0 : index
    %c0_3 = arith.constant 0 : index
    %4 = vector.load %arg3[%c0_2, %c0_3] : memref<128x128xf32, #tpu.memory_space<vmem>>, vector<128x128xf32>
    %cst = arith.constant dense<0.000000e+00> : vector<16x128xf32>
    %5 = tpu.matmul %3, %4, %cst {dimension_numbers = #tpu.dot_dimension_numbers<[1], [0], [0], [1], [0, 0, 1, 1], [], []>} : vector<16x128xf32>, vector<128x128xf32>, vector<16x128xf32> -> vector<16x128xf32>
    %c128_i32 = arith.constant 128 : i32
    %6 = arith.muli %arg1, %c128_i32 : i32
    %7 = tpu.assume_multiple %6, 128 : i32
    %c0_4 = arith.constant 0 : index
    %8 = arith.index_cast %7 : i32 to index
    %9 = vector.load %arg2[%c0_4, %8] : memref<16x128xf32, #tpu.memory_space<vmem>>, vector<16x128xf32>
    %c0_5 = arith.constant 0 : index
    %c0_6 = arith.constant 0 : index
    %10 = vector.load %arg4[%c0_5, %c0_6] : memref<1x128xf32, #tpu.memory_space<vmem>>, vector<1x128xf32>
    %11 = vector.broadcast %10 : vector<1x128xf32> to vector<16x128xf32>
    %12 = arith.addf %5, %11 : vector<16x128xf32>
    %13 = arith.addf %12, %9 : vector<16x128xf32>
    %c0_7 = arith.constant 0 : index
    %c0_8 = arith.constant 0 : index
    %14 = vector.load %arg7[%c0_7, %c0_8] : memref<16x128xf32, #tpu.memory_space<vmem>>, vector<16x128xf32>
    tpu.vector_store %arg7[%c0_7, %c0_8], %13 {strides = array<i32>} : memref<16x128xf32, #tpu.memory_space<vmem>>, vector<16x128xf32>,
    return
  }
  func.func @transform_0(%arg0: i32, %arg1: i32) -> (i32, i32) {
    %c0_i32 = arith.constant 0 : i32
    %c0_i32_0 = arith.constant 0 : i32
    return %arg0, %c0_i32 : i32, i32
  }
  func.func @transform_1(%arg0: i32, %arg1: i32) -> (i32, i32) {
    %c0_i32 = arith.constant 0 : i32
    %c0_i32_0 = arith.constant 0 : i32
    return %c0_i32, %arg1 : i32, i32
  }
  func.func @transform_2(%arg0: i32, %arg1: i32) -> (i32, i32) {
    %c0_i32 = arith.constant 0 : i32
    %c0_i32_0 = arith.constant 0 : i32
    return %c0_i32, %arg1 : i32, i32
  }
  func.func @transform_3(%arg0: i32, %arg1: i32) -> (i32, i32) {
    %c0_i32 = arith.constant 0 : i32
    %c0_i32_0 = arith.constant 0 : i32
    %c0_i32_1 = arith.constant 0 : i32
    return %c0_i32, %c0_i32_0 : i32, i32
  }
  func.func @transform_4(%arg0: i32, %arg1: i32) -> (i32, i32) {
    %c0_i32 = arith.constant 0 : i32
    %c0_i32_0 = arith.constant 0 : i32
    %c0_i32_1 = arith.constant 0 : i32
    return %c0_i32, %c0_i32_0 : i32, i32
  }
  func.func @transform_5(%arg0: i32, %arg1: i32) -> (i32, i32) {
    %c0_i32 = arith.constant 0 : i32
    return %arg0, %arg1 : i32, i32
  }
}

</mosaic_0001>

<bundles_post_ra>
// kernel: tpu_custom_call.1
= control target key start
LH: loop header
LB: loop body
LE: loop exit
PB: predicated region body
PF: predicated region fallthrough
CT: control target
= control target key end

     0   :  { %10 = vsyncpa [#allocation4], 0  ;;  %s522_s0 = inlined_call_operand.hbm [shape: f32[16,128], index: 0, kind: input, shape index: {}]   ;;  %s523_s1 = inlined_call_operand.hbm [shape: f32[128,128], index: 1, kind: input, shape index: {}]   ;;  %s524_s2 = inlined_call_operand.vmem [shape: f32[1,128], index: 2, kind: input, shape index: {}]   ;;  %s525_s3 = inlined_call_operand.vmem [shape: f32[1,128], index: 3, kind: input, shape index: {}]   ;;  %s526_s4 = inlined_call_operand.vmem [shape: f32[1,128], index: 4, kind: input, shape index: {}]   ;;  %s527_s5 = inlined_call_operand.hbm [shape: f32[16,128], index: 5, kind: output, shape index: {}]  }
   0x1   :  { %11 = vsyncpa [#allocation7], 0 }
   0x2   :  { %12 = vsyncpa [#allocation5], 0  ;;  %s413_s18 = smov [#allocation3]   ;;  %s341_s22 = scalar_lea.hbm %s522_s0, 256 }
   0x3   :  { %s18_s19 = sshll.u32 %s413_s18, 4  ;;  %p342_p0 = scmp.ne.s32.totalorder %s522_s0, %s341_s22  ;;  %s19_s19 = int_to_ptr.vmem [resolvable:$true] %s18_s19 }
   0x4   :  { %p345_p1 = scmp.lt.u32.totalorder %s341_s22, %s522_s0 }
   0x6   :  { %p347_p2 = pnand %p345_p1, %p342_p0 }
   0x8   :  { %350 = shalt.err (!%p347_p2)
}
   0x9   :  { %s351_s27 = scalar_lea.vmem %s19_s19, 256  ;;  %p356_p4 = scmp.lt.s32.totalorder %s19_s19, %s19_s19 }
   0xa   :  { %p352_p3 = scmp.ne.s32.totalorder %s19_s19, %s351_s27  ;;  %p357_p5 = scmp.lt.s32.totalorder %s351_s27, %s351_s27 }
   0xc   :  { %p358_p6 = por %p357_p5, %p356_p4 }
   0xe   :  { %p359_p7 = pnand %p358_p6, %p352_p3 }
  0x10   :  { %362 = shalt.err (!%p359_p7)
}
  0x11   :  { %s414_s28 = smov 128   ;;  %s415_s29 = smov 8  }
  0x12   :  { %24 = dma.hbm_to_vmem [thread:$0]  %s522_s0, 256, %s19_s19, [#allocation4], %s414_s28, %s414_s28, %s415_s29  }
  0x13   :  { %s416_s7 = smov [#allocation6]   ;;  %s363_s11 = scalar_lea.hbm %s523_s1, 2048 }
  0x14   :  { %s30_s8 = sshll.u32 %s416_s7, 4  ;;  %p364_p8 = scmp.ne.s32.totalorder %s523_s1, %s363_s11  ;;  %s31_s8 = int_to_ptr.vmem [resolvable:$true] %s30_s8 }
  0x15   :  { %p367_p9 = scmp.lt.u32.totalorder %s363_s11, %s523_s1 }
  0x17   :  { %p369_p10 = pnand %p367_p9, %p364_p8 }
  0x19   :  { %372 = shalt.err (!%p369_p10)
}
  0x1a   :  { %s373_s16 = scalar_lea.vmem %s31_s8, 2048  ;;  %p378_p12 = scmp.lt.s32.totalorder %s31_s8, %s31_s8 }
  0x1b   :  { %p374_p11 = scmp.ne.s32.totalorder %s31_s8, %s373_s16  ;;  %p379_p13 = scmp.lt.s32.totalorder %s373_s16, %s373_s16 }
  0x1d   :  { %p380_p0 = por %p379_p13, %p378_p12 }
  0x1f   :  { %p381_p1 = pnand %p380_p0, %p374_p11 }
  0x21   :  { %384 = shalt.err (!%p381_p1)
}
  0x22   :  { %36 = dma.hbm_to_vmem [thread:$0]  %s523_s1, 2048, %s31_s8, [#allocation7], %s414_s28, %s414_s28, %s415_s29  }
  0x23   :  { %407 = dma.done.wait [#allocation4], 256  }
  0x24   :  { %408 = vsyncadd [#allocation4], 4294967040 }
  0x25   :  { %409 = dma.done.wait [#allocation7], 2048  }
  0x26   :  { %410 = vsyncadd [#allocation7], 4294965248  ;;  %v478_v0 = vld [vmem:[#allocation3] sm:$0xff]  ;;  %v481_v1 = vld [vmem:[#allocation3 + $0x8] sm:$0xff] }
  0x27   :  { %55 = vadd.xlane.f32.xlu0 %v478_v0  ;;  %v113_v10 = vld [vmem:[#allocation6] sm:$0xff]  ;;  %v114_v11 = vld [vmem:[#allocation6 + $0x8] sm:$0xff]  ;;  %v115_v13 = vld [vmem:[#allocation6 + $0x10] sm:$0xff] }
  0x28   :  { %v296_v12 = vpack.c.bf16 %v114_v11, %v113_v10  ;;  %v116_v14 = vld [vmem:[#allocation6 + $0x18] sm:$0xff]  ;;  %v117_v16 = vld [vmem:[#allocation6 + $0x20] sm:$0xff]  ;;  %v118_v17 = vld [vmem:[#allocation6 + $0x28] sm:$0xff] }
  0x29   :  { %v300_v15 = vpack.c.bf16 %v116_v14, %v115_v13  ;;  %v304_v18 = vpack.c.bf16 %v118_v17, %v117_v16  ;;  %v119_v19 = vld [vmem:[#allocation6 + $0x30] sm:$0xff]  ;;  %v120_v20 = vld [vmem:[#allocation6 + $0x38] sm:$0xff]  ;;  %v121_v22 = vld [vmem:[#allocation6 + $0x40] sm:$0xff] }
  0x2a   :  { %297 = vmatprep.subr.bf16.mxu0 %v296_v12  ;;  %v308_v21 = vpack.c.bf16 %v120_v20, %v119_v19  ;;  %v122_v23 = vld [vmem:[#allocation6 + $0x48] sm:$0xff]  ;;  %v123_v24 = vld [vmem:[#allocation6 + $0x50] sm:$0xff]  ;;  %v124_v26 = vld [vmem:[#allocation6 + $0x58] sm:$0xff] }
  0x2b   :  { %57 = vadd.xlane.f32.xlu0 %v481_v1  ;;  %299 = vmatpush3.bf16.msra.mxu0 %v296_v12  ;;  %v312_v25 = vpack.c.bf16 %v122_v23, %v121_v22  ;;  %v316_v27 = vpack.c.bf16 %v124_v26, %v123_v24  ;;  %v125_v28 = vld [vmem:[#allocation6 + $0x60] sm:$0xff]  ;;  %v126_v29 = vld [vmem:[#allocation6 + $0x68] sm:$0xff]  ;;  %v127_v31 = vld [vmem:[#allocation6 + $0x70] sm:$0xff] }
  0x2c   :  { %301 = vmatprep.subr.bf16.mxu0 %v300_v15  ;;  %v320_v30 = vpack.c.bf16 %v126_v29, %v125_v28  ;;  %v128_v32 = vld [vmem:[#allocation6 + $0x78] sm:$0xff]  ;;  %v240_v50 = vld [vmem:[%s525_s3] ss:$0 sm:$0xff]  ;;  %s417_s3 = smov [#allocation8]  }
  0x2d   :  { %v324_v33 = vpack.c.bf16 %v128_v32, %v127_v31  ;;  %v241_v53 = vld [vmem:[%s526_s4] ss:$0 sm:$0xff]  ;;  %s226_s23 = sshll.u32 %s417_s3, 4  ;;  %s227_s23 = int_to_ptr.vmem [resolvable:$true] %s226_s23 }
  0x2e   :  { %v242_v60 = vld [vmem:[%s524_s2] ss:$0 sm:$0xff]  ;;  %s385_s4 = scalar_lea.vmem %s227_s23, 256  ;;  %p390_p3 = scmp.lt.s32.totalorder %s227_s23, %s227_s23 }
  0x2f   :  { %303 = vmatpush3.bf16.msra.mxu0 %v300_v15  ;;  %p386_p2 = scmp.ne.s32.totalorder %s227_s23, %s385_s4  ;;  %p391_p4 = scmp.lt.s32.totalorder %s385_s4, %s385_s4 }
  0x30   :  { %305 = vmatprep.subr.bf16.mxu0 %v304_v18 }
  0x31   :  { %p392_p5 = por %p391_p4, %p390_p3 }
  0x33   :  { %307 = vmatpush3.bf16.msra.mxu0 %v304_v18  ;;  %p393_p6 = pnand %p392_p5, %p386_p2 }
  0x34   :  { %309 = vmatprep.subr.bf16.mxu0 %v308_v21 }
  0x37   :  { %311 = vmatpush3.bf16.msra.mxu0 %v308_v21 }
  0x38   :  { %313 = vmatprep.subr.bf16.mxu0 %v312_v25 }
  0x3b   :  { %315 = vmatpush3.bf16.msra.mxu0 %v312_v25 }
  0x3c   :  { %317 = vmatprep.subr.bf16.mxu0 %v316_v27 }
  0x3f   :  { %319 = vmatpush3.bf16.msra.mxu0 %v316_v27 }
  0x40   :  { %321 = vmatprep.subr.bf16.mxu0 %v320_v30 }
  0x43   :  { %323 = vmatpush3.bf16.msra.mxu0 %v320_v30 }
  0x44   :  { %325 = vmatprep.subr.bf16.mxu0 %v324_v33 }
  0x47   :  { %327 = vmatpush3.bf16.msra.mxu0 %v324_v33 }
  0xb4   :  { %v56_v2 = vpop.xlane.xlu0 %55 }
  0xb5   :  { %v59_v3 = vmul.f32 0.0078125, %v56_v2 }
  0xb7   :  { %v485_v4 = vsub.f32 %v478_v0, %v59_v3 }
  0xb8   :  { %v58_v5 = vpop.xlane.xlu0 %57 }
  0xb9   :  { %v60_v6 = vmul.f32 0.0078125, %v58_v5  ;;  %v63_v7 = vmul.f32 %v485_v4, %v485_v4  ;;  %v96_v51 = vmul.f32 %v240_v50, %v485_v4 }
  0xbb   :  { %v490_v8 = vsub.f32 %v481_v1, %v60_v6  ;;  %65 = vadd.xlane.f32.xlu1 %v63_v7 }
  0xbd   :  { %v64_v9 = vmul.f32 %v490_v8, %v490_v8  ;;  %v97_v55 = vmul.f32 %v240_v50, %v490_v8 }
  0xbf   :  { %67 = vadd.xlane.f32.xlu1 %v64_v9 }
 0x148   :  { %v66_v34 = vpop.xlane.xlu1 %65 }
 0x149   :  { %v69_v35 = vmul.f32 0.007874016, %v66_v34 }
 0x14b   :  { %333 = vrsqrt.f32 %v69_v35  ;;  %vm73_vm0 = vcmp.eq.f32.partialorder %v69_v35, inf  ;;  %v76_v40 = vand.u32 2147483648, %v69_v35  ;;  %vm75_vm1 = vcmp.eq.f32.partialorder %v69_v35, 0.0 }
 0x14c   :  { %v68_v36 = vpop.xlane.xlu1 %67 }
 0x14d   :  { %v70_v37 = vmul.f32 0.007874016, %v68_v36 }
 0x14f   :  { %335 = vrsqrt.f32 %v70_v37  ;;  %vm80_vm2 = vcmp.eq.f32.partialorder %v70_v37, inf  ;;  %v83_v46 = vand.u32 2147483648, %v70_v37  ;;  %vm82_vm3 = vcmp.eq.f32.partialorder %v70_v37, 0.0 }
 0x155   :  { %v334_v38 = vpop.eup %333 }
 0x156   :  { %v72_v39 = vmul.f32 %v334_v38, %v69_v35 }
 0x158   :  { %v74_v41 = vsel %vm73_vm0, %v69_v35, %v72_v39 }
 0x159   :  { %v336_v42 = vpop.eup %335  ;;  %v77_v43 = vsel %vm75_vm1, %v76_v40, %v74_v41 }
 0x15a   :  { %v79_v44 = vmul.f32 %v336_v42, %v70_v37  ;;  %v85_v45 = vadd.f32 1e-06, %v77_v43 }
 0x15c   :  { %v81_v47 = vsel %vm80_vm2, %v70_v37, %v79_v44  ;;  %337 = vrcp.f32 %v85_v45 }
 0x15d   :  { %v84_v48 = vsel %vm82_vm3, %v83_v46, %v81_v47 }
 0x15e   :  { %v86_v49 = vadd.f32 1e-06, %v84_v48 }
 0x160   :  { %339 = vrcp.f32 %v86_v49 }
 0x166   :  { %v338_v52 = vpop.eup %337 }
 0x167   :  { %v98_v54 = vmul.f32 %v338_v52, %v96_v51 }
 0x169   :  { %v107_v56 = vadd.f32 %v241_v53, %v98_v54 }
 0x16a   :  { %v340_v57 = vpop.eup %339 }
 0x16b   :  { %v99_v58 = vmul.f32 %v340_v57, %v97_v55  ;;  %293 = vmatprep.mubr.f32.mxu0 %v107_v56 }
 0x16d   :  { %v108_v59 = vadd.f32 %v241_v53, %v99_v58 }
 0x16f   :  { %294 = vmatmul.mubr.f32.vlgmr.msra.gmra.mrb[0].mxu0 %v108_v59 }
 0x242   :  { %v295_v61 = vpop.f32.mrb[0].mxu0 }
 0x243   :  { %v214_v62 = vadd.f32 %v295_v61, %v242_v60  ;;  %v208_v63 = vpop.f32.mrb[1].mxu0 }
 0x244   :  { %v209_v2 = vadd.f32 %v242_v60, %v208_v63 }
 0x245   :  { %v218_v3 = vadd.f32 %v214_v62, %v481_v1 }
 0x246   :  { %v217_v4 = vadd.f32 %v209_v2, %v478_v0 }
 0x247   :  { %220 = vst [vmem:[#allocation8 + $0x8] sm:$0xff] %v218_v3 }
 0x248   :  { %219 = vst [vmem:[#allocation8] sm:$0xff] %v217_v4 }
 0x249   :  { %396 = shalt.err (!%p393_p6)
}
 0x24a   :  { %s397_s25 = scalar_lea.hbm %s527_s5, 256 }
 0x24b   :  { %p398_p7 = scmp.ne.s32.totalorder %s527_s5, %s397_s25  ;;  %p401_p8 = scmp.lt.u32.totalorder %s397_s25, %s527_s5 }
 0x24d   :  { %p403_p9 = pnand %p401_p8, %p398_p7 }
 0x24f   :  { %406 = shalt.err (!%p403_p9)
}
 0x250   :  { %232 = dma.vmem_to_hbm [thread:$0]  %s227_s23, 256, %s527_s5, [#allocation5], %s414_s28, %s414_s28, %s415_s29  }
 0x251   :  { %411 = dma.done.wait [#allocation5], 256  }
 0x252   :  { %412 = vsyncadd [#allocation5], 4294967040 }
 0x253   :  { %236 = vsyncpa [#allocation4], 1 }
 0x254   :  { %237 = vsyncpa [#allocation7], 1 }
 0x255   :  { %238 = vsyncpa [#allocation5], 1 }

</bundles_post_ra>
